<compile_context>
chip_gen: v7x
topology: tpu7x:2x2x1
jax: 0.10.0
libtpu: 0.0.40
codegen_flags: <defaults>
</compile_context>

<pallas_src>
import functools
import math

import jax
import jax.numpy as jnp
import numpy as np
from jax.experimental import pallas as pl
from jax.experimental.pallas import tpu as pltpu


def _round_up(a, b):
    return (a + b - 1) // b * b


def _club_kernel(x_ref, y_ref, ybar_ref, y2bar_ref,
                 w1_ref, b1_ref, w2_ref, b2_ref,
                 out_ref, *, n, tile, y_dim, matmul_dtype):
    """One grid step handles batch rows [pid*tile, pid*tile + tile)."""
    pid = pl.program_id(0)
    i0 = pid * tile

    # x tile, cast in-register to the MXU dtype (keeps the x HBM traffic at a
    # single native-dtype read; the tiny weights were cast wrapper-side since
    # they are reused by every tile).
    x = x_ref[...].astype(matmul_dtype)                   # [tile, x_dim]

    # Fused layer 1 of BOTH heads: [x_dim, 2*h2] -> one MXU push.
    h = jnp.dot(x, w1_ref[...], preferred_element_type=jnp.float32) + b1_ref[...]
    h = jnp.where(h > 0, h, 0.01 * h)                     # LeakyReLU(0.01), f32

    # Fused (block-diagonal) layer 2 of both heads: [2*h2, 2*y_dim], one push.
    z = jnp.dot(h.astype(matmul_dtype), w2_ref[...],
                preferred_element_type=jnp.float32) + b2_ref[...]
    mu = z[:, :y_dim]                                     # [tile, y_dim]
    logvar = jnp.tanh(z[:, y_dim:])                       # [tile, y_dim]

    inv2 = 0.5 * jnp.exp(-logvar)                         # 1/(2*exp(logvar)), EUP

    # Column moments of the TRUE (unpadded) batch, hoisted to the wrapper.
    ybar = ybar_ref[...]                                  # [1, y_dim]
    y2bar = y2bar_ref[...]                                # [1, y_dim]
    y_tile = y_ref[...].astype(jnp.float32)               # [tile, y_dim]

    # positive - negative, with mean_j (y_j - mu)^2 expanded in moments:
    #   (E[y^2] - 2*mu*E[y] + mu^2) - (mu - y_i)^2, scaled by 1/(2*exp(logvar))
    bracket = (y2bar - 2.0 * mu * ybar + mu * mu) - (mu - y_tile) ** 2
    contrib = bracket * inv2                              # [tile, y_dim]

    # Ragged last tile: rows past the true batch size hold unspecified data;
    # mask them BEFORE the tile reduction.
    row = i0 + jax.lax.broadcasted_iota(jnp.int32, (tile, y_dim), 0)
    contrib = jnp.where(row < n, contrib, 0.0)

    # Lane-dense (1, 8, 128) partial block (same scalar replicated); the
    # wrapper reads [:, 0, 0].  Avoids masked (1,1) partial stores.
    tile_sum = jnp.sum(contrib, keepdims=True)            # (1, 1)
    out_ref[...] = jnp.broadcast_to(tile_sum[None, :, :], out_ref.shape)


def club_forward(x_samples, y_samples,
                 W1mu, b1mu, W2mu, b2mu,
                 W1lv, b1lv, W2lv, b2lv,
                 *, tile=512, matmul_dtype=jnp.bfloat16):
    """Pallas implementation of CLUB.forward(x_samples, y_samples)."""
    n, x_dim = x_samples.shape
    _, y_dim = y_samples.shape
    h2 = W1mu.shape[0]                                    # hidden_size // 2

    # Row tile: multiple of 8, never larger than the (rounded-up) batch.
    tile = max(8, min(_round_up(tile, 8), _round_up(n, 8)))
    num_tiles = pl.cdiv(n, tile)

    f32 = jnp.float32
    y = y_samples.astype(f32)

    # Column moments of the true batch, computed once in the wrapper (O(N*D)).
    ybar = jnp.mean(y, axis=0, keepdims=True)             # [1, y_dim]
    y2bar = jnp.mean(y * y, axis=0, keepdims=True)        # [1, y_dim]

    # Fused weights: layer 1 side-by-side, layer 2 block-diagonal.
    w1 = jnp.concatenate([W1mu.T, W1lv.T], axis=1).astype(matmul_dtype)  # [x_dim, 2*h2]
    b1 = jnp.concatenate([b1mu, b1lv]).reshape(1, 2 * h2).astype(f32)
    w2 = (jnp.zeros((2 * h2, 2 * y_dim), f32)
          .at[:h2, :y_dim].set(W2mu.T.astype(f32))
          .at[h2:, y_dim:].set(W2lv.T.astype(f32))
          .astype(matmul_dtype))                                         # [2*h2, 2*y_dim]
    b2 = jnp.concatenate([b2mu, b2lv]).reshape(1, 2 * y_dim).astype(f32)

    def _resident(shape):                                 # whole array, every tile
        return pl.BlockSpec(shape, lambda i: (0,) * len(shape))

    in_specs = [
        pl.BlockSpec((tile, x_dim), lambda i: (i, 0)),    # x: streamed per tile
        pl.BlockSpec((tile, y_dim), lambda i: (i, 0)),    # y: streamed per tile
        _resident(ybar.shape), _resident(y2bar.shape),
        _resident(w1.shape), _resident(b1.shape),
        _resident(w2.shape), _resident(b2.shape),
    ]
    out_specs = pl.BlockSpec((1, 8, 128), lambda i: (i, 0, 0))

    flops = (2 * n * x_dim * (2 * h2) + 2 * n * (2 * h2) * (2 * y_dim)
             + 14 * n * y_dim)
    cost = pl.CostEstimate(
        flops=int(flops),
        transcendentals=int(2 * n * y_dim),
        bytes_accessed=int(
            n * x_dim * jnp.dtype(x_samples.dtype).itemsize
            + n * y_dim * 4
            + (w1.size + w2.size) * jnp.dtype(matmul_dtype).itemsize
            + (b1.size + b2.size + 2 * y_dim) * 4
            + num_tiles * 8 * 128 * 4),
    )

    partials = pl.pallas_call(
        functools.partial(_club_kernel, n=n, tile=tile, y_dim=y_dim,
                          matmul_dtype=matmul_dtype),
        out_shape=jax.ShapeDtypeStruct((num_tiles, 8, 128), f32),
        grid=(num_tiles,),
        in_specs=in_specs,
        out_specs=out_specs,
        compiler_params=pltpu.CompilerParams(
            dimension_semantics=("parallel",),
            vmem_limit_bytes=32 * 1024 * 1024,
        ),
        cost_estimate=cost,
    )(x_samples, y, ybar, y2bar, w1, b1, w2, b2)

    # One scalar partial per tile at [:, 0, 0]; mean over the true batch size.
    return jnp.sum(partials[:, 0, 0]) / jnp.float32(n)


def _ref_club(x, y, W1mu, b1mu, W2mu, b2mu, W1lv, b1lv, W2lv, b2lv,
              matmul_dtype=jnp.float32):
    """Pure-JAX reference reproducing the PyTorch CLUB.forward (matmul
    operands optionally cast to matmul_dtype, f32 accumulation)."""
    def head(z, w1, b1, w2, b2):
        h = jnp.dot(z.astype(matmul_dtype), w1.T.astype(matmul_dtype),
                    preferred_element_type=jnp.float32) + b1
        h = jnp.where(h > 0, h, 0.01 * h)                 # LeakyReLU(0.01)
        return jnp.dot(h.astype(matmul_dtype), w2.T.astype(matmul_dtype),
                       preferred_element_type=jnp.float32) + b2

    mu = head(x, W1mu, b1mu, W2mu, b2mu)
    logvar = jnp.tanh(head(x, W1lv, b1lv, W2lv, b2lv))
    positive = -(mu - y) ** 2 / 2.0 / jnp.exp(logvar)
    pairwise = (y[None, :, :] - mu[:, None, :]) ** 2      # [N, N, D]
    negative = -jnp.mean(pairwise, axis=1) / 2.0 / jnp.exp(logvar)
    return jnp.mean(positive.sum(-1) - negative.sum(-1))


if __name__ == "__main__":
    # Small shapes consistent with the module's forward.
    N, X_DIM, Y_DIM, HIDDEN = 8, 16, 16, 32
    H2 = HIDDEN // 2

    key = jax.random.PRNGKey(0)
    keys = jax.random.split(key, 10)

    x = jax.random.normal(keys[0], (N, X_DIM), dtype=jnp.float32)
    y = jax.random.normal(keys[1], (N, Y_DIM), dtype=jnp.float32)

    def linear_init(kw, kb, out_f, in_f):
        # Deterministic PyTorch-Linear-style uniform init bounds.
        bound = 1.0 / math.sqrt(in_f)
        W = jax.random.uniform(kw, (out_f, in_f), jnp.float32, -bound, bound)
        b = jax.random.uniform(kb, (out_f,), jnp.float32, -bound, bound)
        return W, b

    W1mu, b1mu = linear_init(keys[2], keys[3], H2, X_DIM)
    W2mu, b2mu = linear_init(keys[4], keys[5], Y_DIM, H2)
    W1lv, b1lv = linear_init(keys[6], keys[7], H2, X_DIM)
    W2lv, b2lv = linear_init(keys[8], keys[9], Y_DIM, H2)

    params = (W1mu, b1mu, W2mu, b2mu, W1lv, b1lv, W2lv, b2lv)

    # Exact-f32 path vs. exact PyTorch-equivalent reference (tight tolerance).
    res_f32 = jax.block_until_ready(
        club_forward(x, y, *params, matmul_dtype=jnp.float32))
    ref_f32 = jax.block_until_ready(_ref_club(x, y, *params))
    np.testing.assert_allclose(np.asarray(res_f32), np.asarray(ref_f32),
                               rtol=1e-4, atol=1e-4)

    # Default bf16-MXU path vs. a precision-matched reference.
    res_bf16 = jax.block_until_ready(club_forward(x, y, *params))
    ref_bf16 = jax.block_until_ready(
        _ref_club(x, y, *params, matmul_dtype=jnp.bfloat16))
    np.testing.assert_allclose(np.asarray(res_bf16), np.asarray(ref_bf16),
                               rtol=5e-3, atol=5e-3)

    print("KERNEL_OK")
</pallas_src>

<mosaic_0001>
module attributes {stable_mosaic.version = 11 : i64} {
  func.func @_club_kernel(%arg0: i32, %arg1: memref<8x16xf32, #tpu.memory_space<vmem>>, %arg2: memref<8x16xf32, #tpu.memory_space<vmem>>, %arg3: memref<1x16xf32, #tpu.memory_space<vmem>>, %arg4: memref<1x16xf32, #tpu.memory_space<vmem>>, %arg5: memref<16x32xf32, #tpu.memory_space<vmem>>, %arg6: memref<1x32xf32, #tpu.memory_space<vmem>>, %arg7: memref<32x32xf32, #tpu.memory_space<vmem>>, %arg8: memref<1x32xf32, #tpu.memory_space<vmem>>, %arg9: memref<1x8x128xf32, #tpu.memory_space<vmem>>) attributes {dimension_semantics = [#tpu.dimension_semantics<parallel>], iteration_bounds = array<i64: 1>, scalar_prefetch = 0 : i64, scratch_operands = 0 : i64, tpu.core_type = #tpu.core_type<tc>, window_params = [{transform_indices = @transform_0, window_bounds = array<i64: 8, 16>}, {transform_indices = @transform_1, window_bounds = array<i64: 8, 16>}, {pipeline_mode = #tpu.pipeline_mode<synchronous>, transform_indices = @transform_2, window_bounds = array<i64: 1, 16>}, {pipeline_mode = #tpu.pipeline_mode<synchronous>, transform_indices = @transform_3, window_bounds = array<i64: 1, 16>}, {pipeline_mode = #tpu.pipeline_mode<synchronous>, transform_indices = @transform_4, window_bounds = array<i64: 16, 32>}, {pipeline_mode = #tpu.pipeline_mode<synchronous>, transform_indices = @transform_5, window_bounds = array<i64: 1, 32>}, {pipeline_mode = #tpu.pipeline_mode<synchronous>, transform_indices = @transform_6, window_bounds = array<i64: 32, 32>}, {pipeline_mode = #tpu.pipeline_mode<synchronous>, transform_indices = @transform_7, window_bounds = array<i64: 1, 32>}, {transform_indices = @transform_8, window_bounds = array<i64: 1, 8, 128>}]} {
    %c8_i32 = arith.constant 8 : i32
    %0 = arith.muli %arg0, %c8_i32 : i32
    %c0 = arith.constant 0 : index
    %c0_0 = arith.constant 0 : index
    %1 = vector.load %arg1[%c0, %c0_0] : memref<8x16xf32, #tpu.memory_space<vmem>>, vector<8x16xf32>
    %c0_1 = arith.constant 0 : index
    %c0_2 = arith.constant 0 : index
    %2 = vector.load %arg5[%c0_1, %c0_2] : memref<16x32xf32, #tpu.memory_space<vmem>>, vector<16x32xf32>
    %cst = arith.constant dense<0.000000e+00> : vector<8x32xf32>
    %3 = tpu.matmul %1, %2, %cst {dimension_numbers = #tpu.dot_dimension_numbers<[1], [0], [0], [1], [0, 0, 1, 1], [], []>} : vector<8x16xf32>, vector<16x32xf32>, vector<8x32xf32> -> vector<8x32xf32>
    %c0_3 = arith.constant 0 : index
    %c0_4 = arith.constant 0 : index
    %4 = vector.load %arg6[%c0_3, %c0_4] : memref<1x32xf32, #tpu.memory_space<vmem>>, vector<1x32xf32>
    %5 = vector.broadcast %4 : vector<1x32xf32> to vector<8x32xf32>
    %6 = arith.addf %3, %5 : vector<8x32xf32>
    %cst_5 = arith.constant 0.000000e+00 : f32
    %7 = vector.broadcast %cst_5 : f32 to vector<8x32xf32>
    %8 = arith.cmpf ogt, %6, %7 : vector<8x32xf32>
    %cst_6 = arith.constant 0.00999999977 : f32
    %9 = vector.broadcast %cst_6 : f32 to vector<8x32xf32>
    %10 = arith.mulf %9, %6 : vector<8x32xf32>
    %11 = arith.select %8, %6, %10 : vector<8x32xi1>, vector<8x32xf32>
    %c0_7 = arith.constant 0 : index
    %c0_8 = arith.constant 0 : index
    %12 = vector.load %arg7[%c0_7, %c0_8] : memref<32x32xf32, #tpu.memory_space<vmem>>, vector<32x32xf32>
    %cst_9 = arith.constant dense<0.000000e+00> : vector<8x32xf32>
    %13 = tpu.matmul %11, %12, %cst_9 {dimension_numbers = #tpu.dot_dimension_numbers<[1], [0], [0], [1], [0, 0, 1, 1], [], []>} : vector<8x32xf32>, vector<32x32xf32>, vector<8x32xf32> -> vector<8x32xf32>
    %c0_10 = arith.constant 0 : index
    %c0_11 = arith.constant 0 : index
    %14 = vector.load %arg8[%c0_10, %c0_11] : memref<1x32xf32, #tpu.memory_space<vmem>>, vector<1x32xf32>
    %15 = vector.broadcast %14 : vector<1x32xf32> to vector<8x32xf32>
    %16 = arith.addf %13, %15 : vector<8x32xf32>
    %17 = vector.extract_strided_slice %16 {offsets = [0, 0], sizes = [8, 16], strides = [1, 1]} : vector<8x32xf32> to vector<8x16xf32>
    %18 = vector.extract_strided_slice %16 {offsets = [0, 16], sizes = [8, 16], strides = [1, 1]} : vector<8x32xf32> to vector<8x16xf32>
    %19 = math.tanh %18 : vector<8x16xf32>
    %cst_12 = arith.constant 0.000000e+00 : f32
    %20 = vector.broadcast %cst_12 : f32 to vector<8x16xf32>
    %21 = arith.subf %20, %19 : vector<8x16xf32>
    %22 = math.exp %21 : vector<8x16xf32>
    %cst_13 = arith.constant 5.000000e-01 : f32
    %23 = vector.broadcast %cst_13 : f32 to vector<8x16xf32>
    %24 = arith.mulf %23, %22 : vector<8x16xf32>
    %c0_14 = arith.constant 0 : index
    %c0_15 = arith.constant 0 : index
    %25 = vector.load %arg3[%c0_14, %c0_15] : memref<1x16xf32, #tpu.memory_space<vmem>>, vector<1x16xf32>
    %c0_16 = arith.constant 0 : index
    %c0_17 = arith.constant 0 : index
    %26 = vector.load %arg4[%c0_16, %c0_17] : memref<1x16xf32, #tpu.memory_space<vmem>>, vector<1x16xf32>
    %c0_18 = arith.constant 0 : index
    %c0_19 = arith.constant 0 : index
    %27 = vector.load %arg2[%c0_18, %c0_19] : memref<8x16xf32, #tpu.memory_space<vmem>>, vector<8x16xf32>
    %cst_20 = arith.constant 2.000000e+00 : f32
    %28 = vector.broadcast %cst_20 : f32 to vector<8x16xf32>
    %29 = arith.mulf %28, %17 : vector<8x16xf32>
    %30 = vector.broadcast %25 : vector<1x16xf32> to vector<8x16xf32>
    %31 = arith.mulf %29, %30 : vector<8x16xf32>
    %32 = vector.broadcast %26 : vector<1x16xf32> to vector<8x16xf32>
    %33 = arith.subf %32, %31 : vector<8x16xf32>
    %34 = arith.mulf %17, %17 : vector<8x16xf32>
    %35 = arith.addf %33, %34 : vector<8x16xf32>
    %36 = arith.subf %17, %27 : vector<8x16xf32>
    %37 = arith.mulf %36, %36 : vector<8x16xf32>
    %38 = arith.subf %35, %37 : vector<8x16xf32>
    %39 = arith.mulf %38, %24 : vector<8x16xf32>
    %40 = tpu.iota {dimensions = array<i32: 0>} : vector<8x16xi32>
    %41 = vector.broadcast %0 : i32 to vector<8x16xi32>
    %42 = arith.addi %41, %40 : vector<8x16xi32>
    %c8_i32_21 = arith.constant 8 : i32
    %43 = vector.broadcast %c8_i32_21 : i32 to vector<8x16xi32>
    %44 = arith.cmpi slt, %42, %43 : vector<8x16xi32>
    %cst_22 = arith.constant 0.000000e+00 : f32
    %45 = vector.broadcast %cst_22 : f32 to vector<8x16xf32>
    %46 = arith.select %44, %39, %45 : vector<8x16xi1>, vector<8x16xf32>
    %47 = vector.shape_cast %46 : vector<8x16xf32> to vector<1x8x16xf32>
    %cst_23 = arith.constant dense<0.000000e+00> : vector<1xf32>
    %48 = vector.multi_reduction <add>, %47, %cst_23 [1, 2] : vector<1x8x16xf32> to vector<1xf32>
    %49 = vector.shape_cast %48 : vector<1xf32> to vector<1x1x1xf32>
    %50 = vector.extract %49[0, 0, 0] : f32 from vector<1x1x1xf32>
    %51 = vector.broadcast %50 : f32 to vector<1x1xf32>
    %52 = vector.shape_cast %51 : vector<1x1xf32> to vector<1x1x1xf32>
    %53 = vector.shape_cast %52 : vector<1x1x1xf32> to vector<1x1x1xf32>
    %54 = vector.broadcast %53 : vector<1x1x1xf32> to vector<1x8x128xf32>
    %c0_24 = arith.constant 0 : index
    %c0_25 = arith.constant 0 : index
    %c0_26 = arith.constant 0 : index
    %55 = vector.load %arg9[%c0_24, %c0_25, %c0_26] : memref<1x8x128xf32, #tpu.memory_space<vmem>>, vector<1x8x128xf32>
    tpu.vector_store %arg9[%c0_24, %c0_25, %c0_26], %54 {strides = array<i32>} : memref<1x8x128xf32, #tpu.memory_space<vmem>>, vector<1x8x128xf32>,
    return
  }
  func.func @transform_0(%arg0: i32) -> (i32, i32) {
    %c0_i32 = arith.constant 0 : i32
    %c0_i32_0 = arith.constant 0 : i32
    return %arg0, %c0_i32 : i32, i32
  }
  func.func @transform_1(%arg0: i32) -> (i32, i32) {
    %c0_i32 = arith.constant 0 : i32
    %c0_i32_0 = arith.constant 0 : i32
    return %arg0, %c0_i32 : i32, i32
  }
  func.func @transform_2(%arg0: i32) -> (i32, i32) {
    %c0_i32 = arith.constant 0 : i32
    %c0_i32_0 = arith.constant 0 : i32
    %c0_i32_1 = arith.constant 0 : i32
    return %c0_i32, %c0_i32_0 : i32, i32
  }
  func.func @transform_3(%arg0: i32) -> (i32, i32) {
    %c0_i32 = arith.constant 0 : i32
    %c0_i32_0 = arith.constant 0 : i32
    %c0_i32_1 = arith.constant 0 : i32
    return %c0_i32, %c0_i32_0 : i32, i32
  }
  func.func @transform_4(%arg0: i32) -> (i32, i32) {
    %c0_i32 = arith.constant 0 : i32
    %c0_i32_0 = arith.constant 0 : i32
    %c0_i32_1 = arith.constant 0 : i32
    return %c0_i32, %c0_i32_0 : i32, i32
  }
  func.func @transform_5(%arg0: i32) -> (i32, i32) {
    %c0_i32 = arith.constant 0 : i32
    %c0_i32_0 = arith.constant 0 : i32
    %c0_i32_1 = arith.constant 0 : i32
    return %c0_i32, %c0_i32_0 : i32, i32
  }
  func.func @transform_6(%arg0: i32) -> (i32, i32) {
    %c0_i32 = arith.constant 0 : i32
    %c0_i32_0 = arith.constant 0 : i32
    %c0_i32_1 = arith.constant 0 : i32
    return %c0_i32, %c0_i32_0 : i32, i32
  }
  func.func @transform_7(%arg0: i32) -> (i32, i32) {
    %c0_i32 = arith.constant 0 : i32
    %c0_i32_0 = arith.constant 0 : i32
    %c0_i32_1 = arith.constant 0 : i32
    return %c0_i32, %c0_i32_0 : i32, i32
  }
  func.func @transform_8(%arg0: i32) -> (i32, i32, i32) {
    %c0_i32 = arith.constant 0 : i32
    %c0_i32_0 = arith.constant 0 : i32
    %c0_i32_1 = arith.constant 0 : i32
    return %arg0, %c0_i32, %c0_i32_0 : i32, i32, i32
  }
}

</mosaic_0001>

<bundles_post_ra>
// kernel: tpu_custom_call.1
= control target key start
LH: loop header
LB: loop body
LE: loop exit
PB: predicated region body
PF: predicated region fallthrough
CT: control target
= control target key end

     0   :  { %13 = vsyncpa [#allocation3], 0  ;;  %s628_s0 = inlined_call_operand.hbm [shape: f32[8,16], index: 0, kind: input, shape index: {}]   ;;  %s629_s1 = inlined_call_operand.hbm [shape: f32[8,16], index: 1, kind: input, shape index: {}]   ;;  %s630_s2 = inlined_call_operand.vmem [shape: f32[1,16], index: 2, kind: input, shape index: {}]   ;;  %s631_s3 = inlined_call_operand.vmem [shape: f32[1,16], index: 3, kind: input, shape index: {}]   ;;  %s632_s4 = inlined_call_operand.hbm [shape: f32[16,32], index: 4, kind: input, shape index: {}]   ;;  %s633_s5 = inlined_call_operand.vmem [shape: f32[1,32], index: 5, kind: input, shape index: {}]   ;;  %s634_s6 = inlined_call_operand.hbm [shape: f32[32,32], index: 6, kind: input, shape index: {}]   ;;  %s635_s7 = inlined_call_operand.vmem [shape: f32[1,32], index: 7, kind: input, shape index: {}]   ;;  %s636_s8 = inlined_call_operand.hbm [shape: f32[1,8,128], index: 8, kind: output, shape index: {}]  }
   0x1   :  { %14 = vsyncpa [#allocation6], 0 }
   0x2   :  { %15 = vsyncpa [#allocation9], 0 }
   0x3   :  { %16 = vsyncpa [#allocation4], 0  ;;  %s498_s27 = smov [#allocation5]   ;;  %s499_s29 = smov [#allocation2]  }
   0x4   :  { %s33_s28 = sshll.u32 %s498_s27, 4  ;;  %s23_s30 = sshll.u32 %s499_s29, 4  ;;  %s34_s28 = int_to_ptr.vmem [resolvable:$true] %s33_s28  ;;  %s24_s30 = int_to_ptr.vmem [resolvable:$true] %s23_s30 }
   0x5   :  { %s380_s11 = scalar_lea.hbm %s629_s1, 128 }
   0x6   :  { %p381_p0 = scmp.ne.s32.totalorder %s629_s1, %s380_s11  ;;  %p384_p1 = scmp.lt.u32.totalorder %s380_s11, %s629_s1 }
   0x8   :  { %p386_p2 = pnand %p384_p1, %p381_p0 }
   0xa   :  { %389 = shalt.err (!%p386_p2)
}
   0xb   :  { %s390_s16 = scalar_lea.vmem %s34_s28, 128  ;;  %p395_p4 = scmp.lt.s32.totalorder %s34_s28, %s34_s28 }
   0xc   :  { %p391_p3 = scmp.ne.s32.totalorder %s34_s28, %s390_s16  ;;  %p396_p5 = scmp.lt.s32.totalorder %s390_s16, %s390_s16 }
   0xe   :  { %p397_p6 = por %p396_p5, %p395_p4 }
  0x10   :  { %p398_p7 = pnand %p397_p6, %p391_p3 }
  0x12   :  { %401 = shalt.err (!%p398_p7)
}
  0x13   :  { %36 = dma.hbm_to_vmem [thread:$0]  %s629_s1, 128, %s34_s28, [#allocation6]  }
  0x14   :  { %s402_s21 = scalar_lea.hbm %s628_s0, 128 }
  0x15   :  { %p403_p8 = scmp.ne.s32.totalorder %s628_s0, %s402_s21  ;;  %p406_p9 = scmp.lt.u32.totalorder %s402_s21, %s628_s0 }
  0x17   :  { %p408_p10 = pnand %p406_p9, %p403_p8 }
  0x19   :  { %411 = shalt.err (!%p408_p10)
}
  0x1a   :  { %s412_s26 = scalar_lea.vmem %s24_s30, 128  ;;  %p417_p12 = scmp.lt.s32.totalorder %s24_s30, %s24_s30 }
  0x1b   :  { %p413_p11 = scmp.ne.s32.totalorder %s24_s30, %s412_s26  ;;  %p418_p13 = scmp.lt.s32.totalorder %s412_s26, %s412_s26 }
  0x1d   :  { %p419_p0 = por %p418_p13, %p417_p12 }
  0x1f   :  { %p420_p1 = pnand %p419_p0, %p413_p11 }
  0x21   :  { %423 = shalt.err (!%p420_p1)
}
  0x22   :  { %26 = dma.hbm_to_vmem [thread:$0]  %s628_s0, 128, %s24_s30, [#allocation3]  }
  0x23   :  { %s500_s28 = smov [#allocation7]   ;;  %s424_s11 = scalar_lea.hbm %s632_s4, 256 }
  0x24   :  { %s46_s29 = sshll.u32 %s500_s28, 4  ;;  %p425_p2 = scmp.ne.s32.totalorder %s632_s4, %s424_s11  ;;  %s47_s29 = int_to_ptr.vmem [resolvable:$true] %s46_s29 }
  0x25   :  { %p428_p3 = scmp.lt.u32.totalorder %s424_s11, %s632_s4 }
  0x27   :  { %p430_p4 = pnand %p428_p3, %p425_p2 }
  0x29   :  { %433 = shalt.err (!%p430_p4)
}
  0x2a   :  { %s434_s16 = scalar_lea.vmem %s47_s29, 256  ;;  %p439_p6 = scmp.lt.s32.totalorder %s47_s29, %s47_s29 }
  0x2b   :  { %p435_p5 = scmp.ne.s32.totalorder %s47_s29, %s434_s16  ;;  %p440_p7 = scmp.lt.s32.totalorder %s434_s16, %s434_s16 }
  0x2d   :  { %p441_p8 = por %p440_p7, %p439_p6 }
  0x2f   :  { %p442_p9 = pnand %p441_p8, %p435_p5 }
  0x31   :  { %445 = shalt.err (!%p442_p9)
}
  0x32   :  { %s501_s0 = smov 128   ;;  %s502_s30 = smov 8  }
  0x33   :  { %52 = dma.hbm_to_vmem [thread:$0]  %s632_s4, 256, %s47_s29, [#allocation6], %s501_s0, %s501_s0, %s502_s30  }
  0x34   :  { %s503_s19 = smov [#allocation8]   ;;  %s446_s23 = scalar_lea.hbm %s634_s6, 512 }
  0x35   :  { %s60_s20 = sshll.u32 %s503_s19, 4  ;;  %p447_p10 = scmp.ne.s32.totalorder %s634_s6, %s446_s23  ;;  %s61_s20 = int_to_ptr.vmem [resolvable:$true] %s60_s20 }
  0x36   :  { %p450_p11 = scmp.lt.u32.totalorder %s446_s23, %s634_s6 }
  0x38   :  { %p452_p12 = pnand %p450_p11, %p447_p10 }
  0x3a   :  { %455 = shalt.err (!%p452_p12)
}
  0x3b   :  { %s456_s27 = scalar_lea.vmem %s61_s20, 512  ;;  %p461_p0 = scmp.lt.s32.totalorder %s61_s20, %s61_s20 }
  0x3c   :  { %p457_p13 = scmp.ne.s32.totalorder %s61_s20, %s456_s27  ;;  %p462_p1 = scmp.lt.s32.totalorder %s456_s27, %s456_s27 }
  0x3e   :  { %p463_p2 = por %p462_p1, %p461_p0 }
  0x40   :  { %p464_p3 = pnand %p463_p2, %p457_p13 }
  0x42   :  { %467 = shalt.err (!%p464_p3)
}
  0x43   :  { %66 = dma.hbm_to_vmem [thread:$0]  %s634_s6, 512, %s61_s20, [#allocation9], %s501_s0, %s501_s0, %s502_s30  }
  0x44   :  { %490 = dma.done.wait [#allocation3], 128  }
  0x45   :  { %491 = vsyncadd [#allocation3], 4294967168 }
  0x46   :  { %492 = dma.done.wait [#allocation6], 384  }
  0x47   :  { %493 = vsyncadd [#allocation6], 4294966912 }
  0x48   :  { %494 = dma.done.wait [#allocation9], 512  }
  0x49   :  { %495 = vsyncadd [#allocation9], 4294966784  ;;  %v504_v0 = vmov 0.0|0.0   ;;  %vm505_vm0 = vmmov 0   ;;  %v506_v1 = vmov 0.0   ;;  %v83_v2 = vld [vmem:[#allocation7] sm:$0xff] }
  0x4a   :  { %354 = vmatprep.subr.bf16.mxu0 %v504_v0  ;;  %340 = vmatprep.mubr.msk.f32.mxu0 %vm505_vm0, %v506_v1  ;;  %v84_v3 = vld [vmem:[#allocation7 + $0x8] sm:$0xff]  ;;  %v169_v5 = vld [vmem:[#allocation8] sm:$0xff]  ;;  %v170_v6 = vld [vmem:[#allocation8 + $0x8] sm:$0xff]  ;;  %vm92_vm1 = vcmask 130048   ;;  %vm180_vm3 = vcmask 261120  }
  0x4b   :  { %357 = vmatprep.subr.bf16.mxu1 %v504_v0  ;;  %351 = vmatprep.mubr.msk.f32.mxu1 %vm505_vm0, %v506_v1  ;;  %v355_v4 = vpack.c.bf16 %v84_v3, %v83_v2  ;;  %v358_v7 = vpack.c.bf16 %v170_v6, %v169_v5  ;;  %v82_v8 = vld [vmem:[#allocation2] sm:$0xff]  ;;  %v171_v9 = vld [vmem:[#allocation8 + $0x10] sm:$0xff]  ;;  %v172_v10 = vld [vmem:[#allocation8 + $0x18] sm:$0xff] }
  0x4c   :  { %v361_v11 = vpack.c.bf16 %v172_v10, %v171_v9  ;;  %v322_v12 = vld [vmem:[%s633_s5] ss:$0 sm:$0xff]  ;;  %s507_s5 = smov 112   ;;  %v261_v31 = vld [vmem:[#allocation5] sm:$0xff] }
  0x4d   :  { %356 = vmatpush3.bf16.msra.mxu0 %v355_v4  ;;  %359 = vmatpush3.bf16.msra.mxu1 %v358_v7  ;;  %v324_v18 = vld [vmem:[%s635_s7] ss:$0 sm:$0xff] }
  0x4e   :  { %360 = vmatprep.subr.bf16.mxu1 %v504_v0  ;;  %v326_v28 = vld [vmem:[%s630_s2] ss:$0 sm:$0xff]  ;;  %s508_s2 = smov [#allocation10]  }
  0x4f   :  { %v327_v30 = vld [vmem:[%s631_s3] ss:$0 sm:$0xff]  ;;  %s311_s3 = sshll.u32 %s508_s2, 4  ;;  %s312_s3 = int_to_ptr.vmem [resolvable:$true] %s311_s3 }
  0x50   :  { %341 = vmatmul.mubr.msk.f32.vlgmr.msra.gmra.mrb[0].mxu0 %vm92_vm1, %v82_v8  ;;  %s468_s15 = scalar_lea.vmem %s312_s3, 128  ;;  %p473_p5 = scmp.lt.s32.totalorder %s312_s3, %s312_s3 }
  0x51   :  { %362 = vmatpush3.bf16.msra.mxu1 %v361_v11  ;;  %p469_p4 = scmp.ne.s32.totalorder %s312_s3, %s468_s15  ;;  %p474_p6 = scmp.lt.s32.totalorder %s468_s15, %s468_s15 }
  0x53   :  { %p475_p7 = por %p474_p6, %p473_p5 }
  0x55   :  { %p476_p8 = pnand %p475_p7, %p469_p4 }
 0x123   :  { %v162_v13 = vpop.f32.mrb[0].mxu0 }
 0x124   :  { %v163_v14 = vadd.f32 %v322_v12, %v162_v13  ;;  %v342_v15 = vpop.f32.mrb[1].mxu0 }
 0x126   :  { %vm166_vm2 = vcmp.gt.f32.partialorder %v163_v14, 0.0  ;;  %v167_v16 = vmul.f32 0.01, %v163_v14 }
 0x128   :  { %v168_v17 = vsel %vm166_vm2, %v163_v14, %v167_v16 }
 0x129   :  { %352 = vmatmul.mubr.msk.f32.vlgmr.msra.gmra.mrb[0].mxu1 %vm180_vm3, %v168_v17 }
 0x1fc   :  { %v250_v19 = vpop.f32.mrb[0].mxu1 }
 0x1fd   :  { %v251_v20 = vadd.f32 %v324_v18, %v250_v19  ;;  %v353_v21 = vpop.f32.mrb[1].mxu1 }
 0x1ff   :  { %376 = vtanh.f32 %v251_v20  ;;  %v262_v27 = vmul.f32 2.0, %v251_v20  ;;  %v277_v33 = vmul.f32 %v251_v20, %v251_v20  ;;  %v279_v34 = vsub.f32 %v251_v20, %v261_v31 }
 0x201   :  { %v269_v29 = vmul.f32 %v326_v28, %v262_v27  ;;  %v280_v36 = vmul.f32 %v279_v34, %v279_v34 }
 0x203   :  { %v276_v32 = vsub.f32 %v327_v30, %v269_v29 }
 0x205   :  { %v278_v35 = vadd.f32 %v277_v33, %v276_v32 }
 0x207   :  { %v281_v37 = vsub.f32 %v278_v35, %v280_v36 }
 0x209   :  { %v377_v22 = vpop.eup %376 }
 0x20a   :  { %v255_v23 = vsub.f32 0.0, %v377_v22 }
 0x20c   :  { %v256_v24 = vmul.f32 1.442695, %v255_v23 }
 0x20e   :  { %378 = vpow2.f32 %v256_v24 }
 0x218   :  { %v379_v25 = vpop.eup %378 }
 0x219   :  { %v258_v26 = vmul.f32 0.5, %v379_v25 }
 0x21b   :  { %283 = vrot.lane.b32.xlu0 %v258_v26, %s507_s5 }
 0x28d   :  { %v284_v38 = vpop.permute.xlu0 %283 }
 0x28e   :  { %v286_v39 = vmul.f32 %v284_v38, %v281_v37 }
 0x290   :  { %v293_v40 = vsel %vm92_vm1, %v286_v39, 0.0 }
 0x291   :  { %294 = vadd.xlane.f32.xlu0 %v293_v40 }
 0x31e   :  { %v295_v41 = vpop.xlane.xlu0 %294 }
 0x31f   :  { %v296_v42 = vrot.slane %v295_v41, 4 }
 0x321   :  { %v297_v43 = vadd.f32 %v296_v42, %v295_v41 }
 0x323   :  { %v298_v44 = vrot.slane %v297_v43, 2 }
 0x325   :  { %v299_v45 = vadd.f32 %v298_v44, %v297_v43 }
 0x327   :  { %v300_v46 = vrot.slane %v299_v45, 1 }
 0x329   :  { %v301_v47 = vadd.f32 %v300_v46, %v299_v45 }
 0x32b   :  { %363 = vpush %v301_v47 }
 0x35c   :  { %s364_s14 = spop %363 }
 0x35d   :  { %v303_v48 = vstv %s364_s14 }
 0x35e   :  { %304 = vst [vmem:[#allocation10] sm:$0xff] %v303_v48 }
 0x35f   :  { %479 = shalt.err (!%p476_p8)
}
 0x360   :  { %s480_s30 = scalar_lea.hbm %s636_s8, 128 }
 0x361   :  { %p481_p9 = scmp.ne.s32.totalorder %s636_s8, %s480_s30  ;;  %p484_p10 = scmp.lt.u32.totalorder %s480_s30, %s636_s8 }
 0x363   :  { %p486_p11 = pnand %p484_p10, %p481_p9 }
 0x365   :  { %489 = shalt.err (!%p486_p11)
}
 0x366   :  { %314 = dma.vmem_to_hbm [thread:$0]  %s312_s3, 128, %s636_s8, [#allocation4]  }
 0x367   :  { %496 = dma.done.wait [#allocation4], 128  }
 0x368   :  { %497 = vsyncadd [#allocation4], 4294967168 }
 0x369   :  { %318 = vsyncpa [#allocation3], 1 }
 0x36a   :  { %319 = vsyncpa [#allocation6], 1 }
 0x36b   :  { %320 = vsyncpa [#allocation9], 1 }
 0x36c   :  { %321 = vsyncpa [#allocation4], 1 }

</bundles_post_ra>
